<compile_context>
chip_gen: v6e
topology: v6e:2x2x1
jax: 0.10.0
libtpu: 0.0.40
codegen_flags: <defaults>
</compile_context>

<pallas_src>
import functools

import jax
import jax.numpy as jnp
from jax.experimental import pallas as pl
from jax.experimental.pallas import tpu as pltpu


def _policy_kernel(x_ref, w1_ref, b1_ref, wmu_ref, bmu_ref, wls_ref, bls_ref,
                   mu_ref, std_ref):
    """One batch tile.  x read in its natural layout; batch on lanes downstream.

    x_ref  : [tb, in_dim]   w1_ref : [H, in_dim]   b1_ref : [H, 1]
    wmu_ref: [out, H]       bmu_ref: [out, 1]
    wls_ref: [out, H]       bls_ref: [out, 1]
    mu_ref : [out, tb]      std_ref: [out, tb]     (lane-dense stores)
    """
    # h = relu(W1 @ x^T + b1): contract in_dim of both operands (NT matmul),
    # result [H, tb] puts the batch on the 128-lane axis.
    h = jax.lax.dot_general(
        w1_ref[...], x_ref[...],
        dimension_numbers=(((1,), (1,)), ((), ())),
        preferred_element_type=jnp.float32)
    h = jnp.maximum(h + b1_ref[...], 0.0)                                 # [H, tb]

    # Heads stay in f32 (M is tiny; kernel is HBM / step-overhead bound, so
    # MXU rate is irrelevant and casting h would just be an extra VPU pass).
    mu = jnp.dot(wmu_ref[...], h, preferred_element_type=jnp.float32) + bmu_ref[...]
    ls = jnp.dot(wls_ref[...], h, preferred_element_type=jnp.float32) + bls_ref[...]

    mu_ref[...] = mu.astype(mu_ref.dtype)
    std_ref[...] = jnp.exp(jnp.tanh(ls)).astype(std_ref.dtype)           # std = exp(tanh(.))


def _cdiv(a, b):
    return -(-a // b)


def _round_up(n, m):
    return _cdiv(n, m) * m


def _pick_batch_tile(B, batch_tile):
    """Lane-tile choice: big tiles to amortize step overhead, >=2 steps when
    B >= 256 (v7x megacore), multiples of 128 lanes for unmasked stores."""
    cap = max(128, (batch_tile // 128) * 128)
    if B < 128:
        return B                      # single tile == full (tiny) batch
    if B <= 256:
        return 128                    # guarantees >= 2 grid steps
    return min(cap, _round_up(_cdiv(B, 2), 128))


@functools.partial(jax.jit, static_argnames=("batch_tile", "out_dtype"))
def mlp_continuous_policy(x, params, *, batch_tile=4096, out_dtype=jnp.float32):
    """MLPContinuousPolicy forward with a Pallas TPU kernel.

    x:       [B, input_dim] float32 (consumed in natural layout, no copies)
    params:  PyTorch layouts: w1 [H, in], b1 [H, 1], w_mu [out, H], b_mu [out, 1],
             w_ls [out, H], b_ls [out, 1]
    returns: (mu [B, out], std [B, out])
    """
    B, in_dim = x.shape
    H = params["w1"].shape[0]
    out_dim = params["w_mu"].shape[0]

    tb = _pick_batch_tile(B, batch_tile)
    grid = (_cdiv(B, tb),)            # last tile may be partial (grid padding)

    const = lambda shape: pl.BlockSpec(shape, lambda i: (0, 0))  # resident weights

    mu_t, std_t = pl.pallas_call(
        _policy_kernel,
        out_shape=(jax.ShapeDtypeStruct((out_dim, B), out_dtype),
                   jax.ShapeDtypeStruct((out_dim, B), out_dtype)),
        grid_spec=pltpu.PrefetchScalarGridSpec(
            num_scalar_prefetch=0,
            grid=grid,
            in_specs=[
                pl.BlockSpec((tb, in_dim), lambda i: (i, 0)),    # x tile, natural layout
                const((H, in_dim)),                              # w1
                const((H, 1)),                                   # b1
                const((out_dim, H)),                             # w_mu
                const((out_dim, 1)),                             # b_mu
                const((out_dim, H)),                             # w_ls
                const((out_dim, 1)),                             # b_ls
            ],
            out_specs=(pl.BlockSpec((out_dim, tb), lambda i: (0, i)),
                       pl.BlockSpec((out_dim, tb), lambda i: (0, i))),
        ),
        compiler_params=pltpu.CompilerParams(
            dimension_semantics=("parallel",)),
    )(x, params["w1"], params["b1"], params["w_mu"], params["b_mu"],
      params["w_ls"], params["b_ls"])

    # Present [B, out] to match the PyTorch API.  Callers that can consume the
    # [out, B] slabs directly save these two small transpose passes.
    return mu_t.T, std_t.T


def init_params(key, input_dim, output_dim, hidden_dim):
    """nn.Linear-style init U(-1/sqrt(fan_in), 1/sqrt(fan_in)), PyTorch layout.

    Weights are [out, in]; biases are [out, 1] column vectors (broadcast over
    the lane/batch axis inside the kernel).
    """
    ks = jax.random.split(key, 6)

    def linear(kw, kb, fan_in, fan_out):
        bound = 1.0 / jnp.sqrt(fan_in)
        w = jax.random.uniform(kw, (fan_out, fan_in), jnp.float32, -bound, bound)
        b = jax.random.uniform(kb, (fan_out, 1), jnp.float32, -bound, bound)
        return w, b

    w1, b1 = linear(ks[0], ks[1], input_dim, hidden_dim)
    w_mu, b_mu = linear(ks[2], ks[3], hidden_dim, output_dim)
    w_ls, b_ls = linear(ks[4], ks[5], hidden_dim, output_dim)
    return dict(w1=w1, b1=b1, w_mu=w_mu, b_mu=b_mu, w_ls=w_ls, b_ls=b_ls)


def reference_forward(x, p):
    h = jnp.maximum(x @ p["w1"].T + p["b1"].T, 0.0)
    mu = h @ p["w_mu"].T + p["b_mu"].T
    std = jnp.exp(jnp.tanh(h @ p["w_ls"].T + p["b_ls"].T))
    return mu, std


if __name__ == "__main__":
    # Small shapes consistent with the module:
    # MLPContinuousPolicy(input_dim=32, output_dim=8, hidden_dims=(128,)).
    input_dim, output_dim, hidden_dim = 32, 8, 128

    key = jax.random.PRNGKey(0)
    k_x, k_p, k_big = jax.random.split(key, 3)
    params = init_params(k_p, input_dim, output_dim, hidden_dim)

    # 1) Tiny batch (B=8): single grid step, block == full batch.
    x_small = jax.random.normal(k_x, (8, input_dim), jnp.float32)
    mu, std = mlp_continuous_policy(x_small, params)
    jax.block_until_ready((mu, std))
    mu_ref, std_ref = reference_forward(x_small, params)
    assert mu.shape == (8, output_dim) and std.shape == (8, output_dim)
    assert jnp.allclose(mu, mu_ref, atol=1e-4, rtol=1e-4)
    assert jnp.allclose(std, std_ref, atol=1e-4, rtol=1e-4)

    # 2) Larger batch (B=1024): tb=512 -> 2 parallel grid steps (v7x megacore).
    x_big = jax.random.normal(k_big, (1024, input_dim), jnp.float32)
    mu_b, std_b = mlp_continuous_policy(x_big, params)
    jax.block_until_ready((mu_b, std_b))
    mu_bref, std_bref = reference_forward(x_big, params)
    assert jnp.allclose(mu_b, mu_bref, atol=1e-4, rtol=1e-4)
    assert jnp.allclose(std_b, std_bref, atol=1e-4, rtol=1e-4)

    # 3) Ragged batch (B=300): tb=256, 2 grid steps, partial last tile handled
    #    by Pallas grid padding (no HBM pad copy of x).
    x_rag = x_big[:300]
    mu_r, std_r = mlp_continuous_policy(x_rag, params)
    jax.block_until_ready((mu_r, std_r))
    mu_rref, std_rref = reference_forward(x_rag, params)
    assert jnp.allclose(mu_r, mu_rref, atol=1e-4, rtol=1e-4)
    assert jnp.allclose(std_r, std_rref, atol=1e-4, rtol=1e-4)

    print("KERNEL_OK")
</pallas_src>

<mosaic_0001>
module attributes {stable_mosaic.version = 11 : i64} {
  func.func @_policy_kernel(%arg0: i32, %arg1: memref<8x32xf32, #tpu.memory_space<vmem>>, %arg2: memref<128x32xf32, #tpu.memory_space<vmem>>, %arg3: memref<128x1xf32, #tpu.memory_space<vmem>>, %arg4: memref<8x128xf32, #tpu.memory_space<vmem>>, %arg5: memref<8x1xf32, #tpu.memory_space<vmem>>, %arg6: memref<8x128xf32, #tpu.memory_space<vmem>>, %arg7: memref<8x1xf32, #tpu.memory_space<vmem>>, %arg8: memref<8x8xf32, #tpu.memory_space<vmem>>, %arg9: memref<8x8xf32, #tpu.memory_space<vmem>>) attributes {dimension_semantics = [#tpu.dimension_semantics<parallel>], iteration_bounds = array<i64: 1>, scalar_prefetch = 0 : i64, scratch_operands = 0 : i64, tpu.core_type = #tpu.core_type<tc>, window_params = [{transform_indices = @transform_0, window_bounds = array<i64: 8, 32>}, {pipeline_mode = #tpu.pipeline_mode<synchronous>, transform_indices = @transform_1, window_bounds = array<i64: 128, 32>}, {pipeline_mode = #tpu.pipeline_mode<synchronous>, transform_indices = @transform_2, window_bounds = array<i64: 128, 1>}, {pipeline_mode = #tpu.pipeline_mode<synchronous>, transform_indices = @transform_3, window_bounds = array<i64: 8, 128>}, {pipeline_mode = #tpu.pipeline_mode<synchronous>, transform_indices = @transform_4, window_bounds = array<i64: 8, 1>}, {pipeline_mode = #tpu.pipeline_mode<synchronous>, transform_indices = @transform_5, window_bounds = array<i64: 8, 128>}, {pipeline_mode = #tpu.pipeline_mode<synchronous>, transform_indices = @transform_6, window_bounds = array<i64: 8, 1>}, {transform_indices = @transform_7, window_bounds = array<i64: 8, 8>}, {transform_indices = @transform_8, window_bounds = array<i64: 8, 8>}]} {
    %c0 = arith.constant 0 : index
    %c0_0 = arith.constant 0 : index
    %0 = vector.load %arg2[%c0, %c0_0] : memref<128x32xf32, #tpu.memory_space<vmem>>, vector<128x32xf32>
    %c0_1 = arith.constant 0 : index
    %c0_2 = arith.constant 0 : index
    %1 = vector.load %arg1[%c0_1, %c0_2] : memref<8x32xf32, #tpu.memory_space<vmem>>, vector<8x32xf32>
    %cst = arith.constant dense<0.000000e+00> : vector<128x8xf32>
    %2 = tpu.matmul %0, %1, %cst {dimension_numbers = #tpu.dot_dimension_numbers<[1], [1], [0], [0], [0, 0, 1, 0], [], []>} : vector<128x32xf32>, vector<8x32xf32>, vector<128x8xf32> -> vector<128x8xf32>
    %c0_3 = arith.constant 0 : index
    %c0_4 = arith.constant 0 : index
    %3 = vector.load %arg3[%c0_3, %c0_4] : memref<128x1xf32, #tpu.memory_space<vmem>>, vector<128x1xf32>
    %4 = vector.broadcast %3 : vector<128x1xf32> to vector<128x8xf32>
    %5 = arith.addf %2, %4 : vector<128x8xf32>
    %cst_5 = arith.constant 0.000000e+00 : f32
    %6 = vector.broadcast %cst_5 : f32 to vector<128x8xf32>
    %7 = arith.maximumf %5, %6 : vector<128x8xf32>
    %c0_6 = arith.constant 0 : index
    %c0_7 = arith.constant 0 : index
    %8 = vector.load %arg4[%c0_6, %c0_7] : memref<8x128xf32, #tpu.memory_space<vmem>>, vector<8x128xf32>
    %cst_8 = arith.constant dense<0.000000e+00> : vector<8x8xf32>
    %9 = tpu.matmul %8, %7, %cst_8 {dimension_numbers = #tpu.dot_dimension_numbers<[1], [0], [0], [1], [0, 0, 1, 1], [], []>} : vector<8x128xf32>, vector<128x8xf32>, vector<8x8xf32> -> vector<8x8xf32>
    %c0_9 = arith.constant 0 : index
    %c0_10 = arith.constant 0 : index
    %10 = vector.load %arg5[%c0_9, %c0_10] : memref<8x1xf32, #tpu.memory_space<vmem>>, vector<8x1xf32>
    %11 = vector.broadcast %10 : vector<8x1xf32> to vector<8x8xf32>
    %12 = arith.addf %9, %11 : vector<8x8xf32>
    %c0_11 = arith.constant 0 : index
    %c0_12 = arith.constant 0 : index
    %13 = vector.load %arg6[%c0_11, %c0_12] : memref<8x128xf32, #tpu.memory_space<vmem>>, vector<8x128xf32>
    %cst_13 = arith.constant dense<0.000000e+00> : vector<8x8xf32>
    %14 = tpu.matmul %13, %7, %cst_13 {dimension_numbers = #tpu.dot_dimension_numbers<[1], [0], [0], [1], [0, 0, 1, 1], [], []>} : vector<8x128xf32>, vector<128x8xf32>, vector<8x8xf32> -> vector<8x8xf32>
    %c0_14 = arith.constant 0 : index
    %c0_15 = arith.constant 0 : index
    %15 = vector.load %arg7[%c0_14, %c0_15] : memref<8x1xf32, #tpu.memory_space<vmem>>, vector<8x1xf32>
    %16 = vector.broadcast %15 : vector<8x1xf32> to vector<8x8xf32>
    %17 = arith.addf %14, %16 : vector<8x8xf32>
    %c0_16 = arith.constant 0 : index
    %c0_17 = arith.constant 0 : index
    %18 = vector.load %arg8[%c0_16, %c0_17] : memref<8x8xf32, #tpu.memory_space<vmem>>, vector<8x8xf32>
    tpu.vector_store %arg8[%c0_16, %c0_17], %12 {strides = array<i32>} : memref<8x8xf32, #tpu.memory_space<vmem>>, vector<8x8xf32>,
    %19 = math.tanh %17 : vector<8x8xf32>
    %20 = math.exp %19 : vector<8x8xf32>
    %c0_18 = arith.constant 0 : index
    %c0_19 = arith.constant 0 : index
    %21 = vector.load %arg9[%c0_18, %c0_19] : memref<8x8xf32, #tpu.memory_space<vmem>>, vector<8x8xf32>
    tpu.vector_store %arg9[%c0_18, %c0_19], %20 {strides = array<i32>} : memref<8x8xf32, #tpu.memory_space<vmem>>, vector<8x8xf32>,
    return
  }
  func.func @transform_0(%arg0: i32) -> (i32, i32) {
    %c0_i32 = arith.constant 0 : i32
    %c0_i32_0 = arith.constant 0 : i32
    return %arg0, %c0_i32 : i32, i32
  }
  func.func @transform_1(%arg0: i32) -> (i32, i32) {
    %c0_i32 = arith.constant 0 : i32
    %c0_i32_0 = arith.constant 0 : i32
    %c0_i32_1 = arith.constant 0 : i32
    return %c0_i32, %c0_i32_0 : i32, i32
  }
  func.func @transform_2(%arg0: i32) -> (i32, i32) {
    %c0_i32 = arith.constant 0 : i32
    %c0_i32_0 = arith.constant 0 : i32
    %c0_i32_1 = arith.constant 0 : i32
    return %c0_i32, %c0_i32_0 : i32, i32
  }
  func.func @transform_3(%arg0: i32) -> (i32, i32) {
    %c0_i32 = arith.constant 0 : i32
    %c0_i32_0 = arith.constant 0 : i32
    %c0_i32_1 = arith.constant 0 : i32
    return %c0_i32, %c0_i32_0 : i32, i32
  }
  func.func @transform_4(%arg0: i32) -> (i32, i32) {
    %c0_i32 = arith.constant 0 : i32
    %c0_i32_0 = arith.constant 0 : i32
    %c0_i32_1 = arith.constant 0 : i32
    return %c0_i32, %c0_i32_0 : i32, i32
  }
  func.func @transform_5(%arg0: i32) -> (i32, i32) {
    %c0_i32 = arith.constant 0 : i32
    %c0_i32_0 = arith.constant 0 : i32
    %c0_i32_1 = arith.constant 0 : i32
    return %c0_i32, %c0_i32_0 : i32, i32
  }
  func.func @transform_6(%arg0: i32) -> (i32, i32) {
    %c0_i32 = arith.constant 0 : i32
    %c0_i32_0 = arith.constant 0 : i32
    %c0_i32_1 = arith.constant 0 : i32
    return %c0_i32, %c0_i32_0 : i32, i32
  }
  func.func @transform_7(%arg0: i32) -> (i32, i32) {
    %c0_i32 = arith.constant 0 : i32
    %c0_i32_0 = arith.constant 0 : i32
    return %c0_i32, %arg0 : i32, i32
  }
  func.func @transform_8(%arg0: i32) -> (i32, i32) {
    %c0_i32 = arith.constant 0 : i32
    %c0_i32_0 = arith.constant 0 : i32
    return %c0_i32, %arg0 : i32, i32
  }
}

</mosaic_0001>

<bundles_post_ra>
// kernel: mlp_continuous_policy.1
= control target key start
LH: loop header
LB: loop body
LE: loop exit
PB: predicated region body
PF: predicated region fallthrough
CT: control target
= control target key end

     0   :  { %vm141_vm0 = vcmask 261120   ;;  %v695_v2 = vmov 0   ;;  %v696_v36 = vmov 0.0   ;;  %vm697_vm1 = vmmov 0   ;;  %s930_s0 = inlined_call_operand.vmem [shape: f32[8,32], index: 0, kind: input, shape index: {}]   ;;  %s931_s1 = inlined_call_operand.vmem [shape: f32[128,32], index: 1, kind: input, shape index: {}]   ;;  %s932_s2 = inlined_call_operand.vmem [shape: f32[128,1], index: 2, kind: input, shape index: {}]   ;;  %s933_s6 = inlined_call_operand.vmem [shape: f32[8,1], index: 6, kind: input, shape index: {}]   ;;  %s934_s4 = inlined_call_operand.vmem [shape: f32[8,1], index: 4, kind: input, shape index: {}]   ;;  %s935_s3 = inlined_call_operand.vmem [shape: f32[8,128], index: 3, kind: input, shape index: {}]   ;;  %s936_s5 = inlined_call_operand.vmem [shape: f32[8,128], index: 5, kind: input, shape index: {}]   ;;  %s937_s7 = inlined_call_operand.vmem [shape: f32[8,8], index: 7, kind: output, shape index: {0}]   ;;  %s938_s8 = inlined_call_operand.vmem [shape: f32[8,8], index: 8, kind: output, shape index: {1}]  }
   0x1   :  { %v44_v0 = vld [vmem:[%s930_s0] sm:$0xff]  ;;  %689 = vset.pattern.permute.xlu0 %v695_v2  ;;  %690 = vset.pattern.permute.xlu1 %v695_v2  ;;  %v29_v3 = vld [vmem:[%s931_s1 + $0x8] sm:$0xff]  ;;  %v30_v4 = vld [vmem:[%s931_s1 + $0x10] sm:$0xff]  ;;  %vm508_vm2 = vcmask 64512  }
   0x2   :  { %v28_v1 = vld [vmem:[%s931_s1] sm:$0xff]  ;;  %590 = vmatprep.subr.msk.mxu0 %vm141_vm0, %v44_v0  ;;  %v60_v5 = vld [vmem:[%s932_s2 + $0x78] sm:$0xff]  ;;  %v58_v7 = vld [vmem:[%s932_s2 + $0x68] sm:$0xff]  ;;  %616 = vmatprep.subr.mxu1 %v696_v36 }
   0x3   :  { %592 = vmatprep.mubr.msk.f32.mxu0 %vm141_vm0, %v28_v1  ;;  %591 = vmatpush3.xpose.msk.msra.mxu0 %vm141_vm0, %v44_v0  ;;  %v31_v6 = vld [vmem:[%s931_s1 + $0x18] sm:$0xff]  ;;  %v32_v8 = vld [vmem:[%s931_s1 + $0x20] sm:$0xff]  ;;  %v59_v9 = vld [vmem:[%s932_s2 + $0x70] sm:$0xff] }
   0x4   :  { %138 = vperm.xlu0 %689, %v60_v5   ;;  %128 = vperm.xlu1 %690, %v58_v7   ;;  %v57_v10 = vld [vmem:[%s932_s2 + $0x60] sm:$0xff]  ;;  %v33_v11 = vld [vmem:[%s931_s1 + $0x28] sm:$0xff]  ;;  %v34_v12 = vld [vmem:[%s931_s1 + $0x30] sm:$0xff] }
   0x5   :  { %v56_v13 = vld [vmem:[%s932_s2 + $0x58] sm:$0xff]  ;;  %v55_v14 = vld [vmem:[%s932_s2 + $0x50] sm:$0xff]  ;;  %v36_v16 = vld [vmem:[%s931_s1 + $0x40] sm:$0xff]  ;;  %651 = vmatprep.subr.mxu0 %v696_v36  ;;  %648 = vmatprep.mubr.msk.f32.mxu1 %vm697_vm1, %v696_v36 }
   0x6   :  { %593 = vmatmul.mubr.msk.f32.vlgmr.msra.gmra.mxu0 %vm141_vm0, %v29_v3  ;;  %v35_v15 = vld [vmem:[%s931_s1 + $0x38] sm:$0xff]  ;;  %v54_v17 = vld [vmem:[%s932_s2 + $0x48] sm:$0xff]  ;;  %v53_v18 = vld [vmem:[%s932_s2 + $0x40] sm:$0xff] }
   0x7   :  { %595 = vmatprep.mubr.msk.f32.mxu0 %vm141_vm0, %v30_v4  ;;  %v37_v19 = vld [vmem:[%s931_s1 + $0x48] sm:$0xff]  ;;  %v38_v20 = vld [vmem:[%s931_s1 + $0x50] sm:$0xff]  ;;  %v52_v21 = vld [vmem:[%s932_s2 + $0x38] sm:$0xff] }
   0x8   :  { %133 = vperm.xlu0 %689, %v59_v9   ;;  %123 = vperm.xlu1 %690, %v57_v10   ;;  %v51_v22 = vld [vmem:[%s932_s2 + $0x30] sm:$0xff]  ;;  %v39_v23 = vld [vmem:[%s931_s1 + $0x58] sm:$0xff]  ;;  %v40_v24 = vld [vmem:[%s931_s1 + $0x60] sm:$0xff] }
   0x9   :  { %v50_v25 = vld [vmem:[%s932_s2 + $0x28] sm:$0xff]  ;;  %v49_v26 = vld [vmem:[%s932_s2 + $0x20] sm:$0xff]  ;;  %v42_v28 = vld [vmem:[%s931_s1 + $0x70] sm:$0xff] }
   0xa   :  { %596 = vmatmul.mubr.msk.f32.gmra.mxu0 %vm141_vm0, %v31_v6  ;;  %v41_v27 = vld [vmem:[%s931_s1 + $0x68] sm:$0xff]  ;;  %v48_v29 = vld [vmem:[%s932_s2 + $0x18] sm:$0xff]  ;;  %v47_v30 = vld [vmem:[%s932_s2 + $0x10] sm:$0xff] }
   0xb   :  { %598 = vmatprep.mubr.msk.f32.mxu0 %vm141_vm0, %v32_v8  ;;  %v43_v31 = vld [vmem:[%s931_s1 + $0x78] sm:$0xff]  ;;  %v46_v32 = vld [vmem:[%s932_s2 + $0x8] sm:$0xff]  ;;  %v45_v33 = vld [vmem:[%s932_s2] sm:$0xff] }
   0xc   :  { %118 = vperm.xlu0 %689, %v56_v13   ;;  %113 = vperm.xlu1 %690, %v55_v14   ;;  %v432_v34 = vld [vmem:[%s933_s6] sm:$0xff] }
   0xd   :  { %v355_v35 = vld [vmem:[%s934_s4] sm:$0xff] }
   0xe   :  { %599 = vmatmul.mubr.msk.f32.gmra.mxu0 %vm141_vm0, %v33_v11 }
   0xf   :  { %601 = vmatprep.mubr.msk.f32.mxu0 %vm141_vm0, %v34_v12 }
  0x10   :  { %108 = vperm.xlu0 %689, %v54_v17   ;;  %103 = vperm.xlu1 %690, %v53_v18  }
  0x12   :  { %602 = vmatmul.mubr.msk.f32.gmra.mxu0 %vm141_vm0, %v35_v15 }
  0x13   :  { %604 = vmatprep.mubr.msk.f32.mxu0 %vm141_vm0, %v36_v16 }
  0x14   :  { %98 = vperm.xlu0 %689, %v52_v21   ;;  %93 = vperm.xlu1 %690, %v51_v22  }
  0x16   :  { %605 = vmatmul.mubr.msk.f32.gmra.mxu0 %vm141_vm0, %v37_v19 }
  0x17   :  { %607 = vmatprep.mubr.msk.f32.mxu0 %vm141_vm0, %v38_v20 }
  0x18   :  { %88 = vperm.xlu0 %689, %v50_v25   ;;  %83 = vperm.xlu1 %690, %v49_v26  }
  0x1a   :  { %608 = vmatmul.mubr.msk.f32.gmra.mxu0 %vm141_vm0, %v39_v23 }
  0x1b   :  { %610 = vmatprep.mubr.msk.f32.mxu0 %vm141_vm0, %v40_v24 }
  0x1c   :  { %78 = vperm.xlu0 %689, %v48_v29   ;;  %73 = vperm.xlu1 %690, %v47_v30  }
  0x1e   :  { %611 = vmatmul.mubr.msk.f32.gmra.mxu0 %vm141_vm0, %v41_v27 }
  0x1f   :  { %613 = vmatprep.mubr.msk.f32.mxu0 %vm141_vm0, %v42_v28 }
  0x20   :  { %68 = vperm.xlu0 %689, %v46_v32   ;;  %63 = vperm.xlu1 %690, %v45_v33  }
  0x22   :  { %614 = vmatmul.mubr.msk.f32.gmra.mxu0 %vm141_vm0, %v43_v31 }
  0x23   :  { %683 = vmatprep.mubr.msk.f32.mxu0 %vm697_vm1, %v696_v36 }
  0x24   :  { %435 = vperm.xlu0 %689, %v432_v34   ;;  %358 = vperm.xlu1 %690, %v355_v35  }
  0x7f   :  { %v139_v42 = vpop.permute.xlu0 %138  ;;  %v129_v44 = vpop.permute.xlu1 %128 }
  0x83   :  { %v134_v47 = vpop.permute.xlu0 %133  ;;  %v124_v49 = vpop.permute.xlu1 %123 }
  0x87   :  { %v119_v52 = vpop.permute.xlu0 %118  ;;  %v114_v54 = vpop.permute.xlu1 %113 }
  0x8b   :  { %v109_v57 = vpop.permute.xlu0 %108  ;;  %v104_v60 = vpop.permute.xlu1 %103 }
  0x8f   :  { %v99_v3 = vpop.permute.xlu0 %98  ;;  %v94_v6 = vpop.permute.xlu1 %93 }
  0x93   :  { %v89_v11 = vpop.permute.xlu0 %88  ;;  %v84_v14 = vpop.permute.xlu1 %83 }
  0x97   :  { %v79_v19 = vpop.permute.xlu0 %78  ;;  %v74_v22 = vpop.permute.xlu1 %73 }
  0x9b   :  { %v69_v27 = vpop.permute.xlu0 %68  ;;  %v64_v30 = vpop.permute.xlu1 %63 }
  0xc6   :  { %v870_v37 = vpop.f32.mrf.mxu0 }
  0xc7   :  { %v265_v31 = vadd.f32 %v870_v37, %v69_v27 }
  0xc8   :  { %v872_v38 = vpop.f32.mrf.mxu0 }
  0xc9   :  { %v260_v33 = vadd.f32 %v872_v38, %v64_v30  ;;  %v339_v35 = vmax.f32 %v265_v31, 0.0  ;;  %v354_v38 = vld [vmem:[%s935_s3] sm:$0xff] }
  0xca   :  { %v874_v39 = vpop.f32.mrf.mxu0 }
  0xcb   :  { %v275_v25 = vadd.f32 %v874_v39, %v79_v19  ;;  %v338_v37 = vmax.f32 %v260_v33, 0.0  ;;  %v431_v39 = vld [vmem:[%s936_s5] sm:$0xff] }
  0xcc   :  { %v876_v40 = vpop.f32.mrf.mxu0 }
  0xcd   :  { %v270_v28 = vadd.f32 %v876_v40, %v74_v22  ;;  %v341_v32 = vmax.f32 %v275_v25, 0.0  ;;  %v436_v40 = vpop.permute.xlu0 %435 }
  0xce   :  { %v878_v41 = vpop.f32.mrf.mxu0 }
  0xcf   :  { %v285_v20 = vadd.f32 %v878_v41, %v89_v11  ;;  %v340_v34 = vmax.f32 %v270_v28, 0.0  ;;  %v359_v41 = vpop.permute.xlu1 %358 }
  0xd0   :  { %v880_v43 = vpop.f32.mrf.mxu0 }
  0xd1   :  { %v280_v23 = vadd.f32 %v880_v43, %v84_v14  ;;  %v343_v26 = vmax.f32 %v285_v20, 0.0 }
  0xd2   :  { %v603_v45 = vpop.f32.mrf.mxu0 }
  0xd3   :  { %v295_v15 = vadd.f32 %v603_v45, %v99_v3  ;;  %v342_v29 = vmax.f32 %v280_v23, 0.0 }
  0xd4   :  { %v289_v46 = vpop.f32.mrf.mxu0 }
  0xd5   :  { %v290_v17 = vadd.f32 %v289_v46, %v94_v6  ;;  %v345_v21 = vmax.f32 %v295_v15, 0.0 }
  0xd6   :  { %v606_v48 = vpop.f32.mrf.mxu0 }
  0xd7   :  { %v305_v9 = vadd.f32 %v606_v48, %v109_v57  ;;  %v344_v24 = vmax.f32 %v290_v17, 0.0 }
  0xd8   :  { %v299_v50 = vpop.f32.mrf.mxu0 }
  0xd9   :  { %v300_v12 = vadd.f32 %v299_v50, %v104_v60  ;;  %v347_v16 = vmax.f32 %v305_v9, 0.0 }
  0xda   :  { %v609_v51 = vpop.f32.mrf.mxu0 }
  0xdb   :  { %v315_v4 = vadd.f32 %v609_v51, %v119_v52  ;;  %v346_v18 = vmax.f32 %v300_v12, 0.0 }
  0xdc   :  { %v309_v53 = vpop.f32.mrf.mxu0 }
  0xdd   :  { %v310_v7 = vadd.f32 %v309_v53, %v114_v54  ;;  %v349_v10 = vmax.f32 %v315_v4, 0.0 }
  0xde   :  { %v612_v55 = vpop.f32.mrf.mxu0 }
  0xdf   :  { %v325_v62 = vadd.f32 %v612_v55, %v129_v44  ;;  %v348_v13 = vmax.f32 %v310_v7, 0.0 }
  0xe0   :  { %v319_v56 = vpop.f32.mrf.mxu0 }
  0xe1   :  { %v320_v1 = vadd.f32 %v319_v56, %v124_v49  ;;  %v351_v5 = vmax.f32 %v325_v62, 0.0 }
  0xe2   :  { %v615_v58 = vpop.f32.mrf.mxu0 }
  0xe3   :  { %v335_v59 = vadd.f32 %v615_v58, %v139_v42  ;;  %v350_v8 = vmax.f32 %v320_v1, 0.0 }
  0xe4   :  { %v329_v61 = vpop.f32.mrf.mxu0 }
  0xe5   :  { %v353_v63 = vmax.f32 %v335_v59, 0.0  ;;  %v330_v0 = vadd.f32 %v329_v61, %v134_v47 }
  0xe7   :  { %v352_v2 = vmax.f32 %v330_v0, 0.0  ;;  %617 = vmatpush3.msra.mxu1 %v353_v63  ;;  %652 = vmatpush3.msra.mxu0 %v353_v63 }
  0xe8   :  { %618 = vmatprep.subr.mxu1 %v696_v36  ;;  %653 = vmatprep.subr.mxu0 %v696_v36 }
  0xe9   :  { %619 = vmatpush3.msra.mxu1 %v352_v2  ;;  %654 = vmatpush3.msra.mxu0 %v352_v2 }
  0xea   :  { %620 = vmatprep.subr.mxu1 %v696_v36  ;;  %655 = vmatprep.subr.mxu0 %v696_v36 }
  0xeb   :  { %621 = vmatpush3.msra.mxu1 %v351_v5  ;;  %656 = vmatpush3.msra.mxu0 %v351_v5 }
  0xec   :  { %622 = vmatprep.subr.mxu1 %v696_v36  ;;  %657 = vmatprep.subr.mxu0 %v696_v36 }
  0xed   :  { %623 = vmatpush3.msra.mxu1 %v350_v8  ;;  %658 = vmatpush3.msra.mxu0 %v350_v8 }
  0xee   :  { %624 = vmatprep.subr.mxu1 %v696_v36  ;;  %659 = vmatprep.subr.mxu0 %v696_v36 }
  0xef   :  { %625 = vmatpush3.msra.mxu1 %v349_v10  ;;  %660 = vmatpush3.msra.mxu0 %v349_v10 }
  0xf0   :  { %626 = vmatprep.subr.mxu1 %v696_v36  ;;  %661 = vmatprep.subr.mxu0 %v696_v36 }
  0xf1   :  { %627 = vmatpush3.msra.mxu1 %v348_v13  ;;  %662 = vmatpush3.msra.mxu0 %v348_v13 }
  0xf2   :  { %628 = vmatprep.subr.mxu1 %v696_v36  ;;  %663 = vmatprep.subr.mxu0 %v696_v36 }
  0xf3   :  { %629 = vmatpush3.msra.mxu1 %v347_v16  ;;  %664 = vmatpush3.msra.mxu0 %v347_v16 }
  0xf4   :  { %630 = vmatprep.subr.mxu1 %v696_v36  ;;  %665 = vmatprep.subr.mxu0 %v696_v36 }
  0xf5   :  { %631 = vmatpush3.msra.mxu1 %v346_v18  ;;  %666 = vmatpush3.msra.mxu0 %v346_v18 }
  0xf6   :  { %632 = vmatprep.subr.mxu1 %v696_v36  ;;  %667 = vmatprep.subr.mxu0 %v696_v36 }
  0xf7   :  { %633 = vmatpush3.msra.mxu1 %v345_v21  ;;  %668 = vmatpush3.msra.mxu0 %v345_v21 }
  0xf8   :  { %634 = vmatprep.subr.mxu1 %v696_v36  ;;  %669 = vmatprep.subr.mxu0 %v696_v36 }
  0xf9   :  { %635 = vmatpush3.msra.mxu1 %v344_v24  ;;  %670 = vmatpush3.msra.mxu0 %v344_v24 }
  0xfa   :  { %636 = vmatprep.subr.mxu1 %v696_v36  ;;  %671 = vmatprep.subr.mxu0 %v696_v36 }
  0xfb   :  { %637 = vmatpush3.msra.mxu1 %v343_v26  ;;  %672 = vmatpush3.msra.mxu0 %v343_v26 }
  0xfc   :  { %638 = vmatprep.subr.mxu1 %v696_v36  ;;  %673 = vmatprep.subr.mxu0 %v696_v36 }
  0xfd   :  { %639 = vmatpush3.msra.mxu1 %v342_v29  ;;  %674 = vmatpush3.msra.mxu0 %v342_v29 }
  0xfe   :  { %640 = vmatprep.subr.mxu1 %v696_v36  ;;  %675 = vmatprep.subr.mxu0 %v696_v36 }
  0xff   :  { %641 = vmatpush3.msra.mxu1 %v341_v32  ;;  %676 = vmatpush3.msra.mxu0 %v341_v32 }
 0x100   :  { %642 = vmatprep.subr.mxu1 %v696_v36  ;;  %677 = vmatprep.subr.mxu0 %v696_v36 }
 0x101   :  { %643 = vmatpush3.msra.mxu1 %v340_v34  ;;  %678 = vmatpush3.msra.mxu0 %v340_v34 }
 0x102   :  { %644 = vmatprep.subr.mxu1 %v696_v36  ;;  %679 = vmatprep.subr.mxu0 %v696_v36 }
 0x103   :  { %645 = vmatpush3.msra.mxu1 %v339_v35  ;;  %680 = vmatpush3.msra.mxu0 %v339_v35 }
 0x104   :  { %646 = vmatprep.subr.mxu1 %v696_v36  ;;  %681 = vmatprep.subr.mxu0 %v696_v36 }
 0x105   :  { %647 = vmatpush3.msra.mxu1 %v338_v37  ;;  %682 = vmatpush3.msra.mxu0 %v338_v37 }
 0x106   :  { %649 = vmatmul.mubr.f32.vlgmr.msra.gmra.mxu1 %v354_v38  ;;  %684 = vmatmul.mubr.f32.vlgmr.msra.gmra.mxu0 %v431_v39 }
 0x1c6   :  { %v427_v42 = vpop.f32.mrf.mxu1  ;;  %v504_v43 = vpop.f32.mrf.mxu0 }
 0x1c7   :  { %v428_v44 = vadd.f32 %v427_v42, %v359_v41  ;;  %v505_v45 = vadd.f32 %v504_v43, %v436_v40 }
 0x1c8   :  { %v685_v46 = vpop.f32.mrf.mxu0  ;;  %v650_v47 = vpop.f32.mrf.mxu1 }
 0x1c9   :  { %509 = vst.msk [vmem:[%s937_s7] sm:$0xff] %vm508_vm2, %v428_v44  ;;  %691 = vtanh.f32 %v505_v45 }
 0x1d6   :  { %v692_v48 = vpop.eup %691 }
 0x1d7   :  { %v511_v36 = vmul.f32 1.442695, %v692_v48 }
 0x1d9   :  { %693 = vpow2.f32 %v511_v36 }
 0x1e6   :  { %v694_v49 = vpop.eup %693 }
 0x1e7   :  { %513 = vst.msk [vmem:[%s938_s8] sm:$0xff] %vm508_vm2, %v694_v49 }

</bundles_post_ra>
